<compile_context>
chip_gen: v6e
topology: v6e:2x2x1
jax: 0.10.0
libtpu: 0.0.40
codegen_flags: <defaults>
</compile_context>

<pallas_src>
import functools
import math

import jax
import jax.numpy as jnp
from jax.experimental import pallas as pl
from jax.experimental.pallas import tpu as pltpu


def _mc_clf_kernel(x_ref, w_enc_ref, b_enc_ref, eps_ref, w_c_ref, b_c_ref,
                   out_ref, *, n_samples):
    # x:     [TB, D]       bf16   (batch tile)
    # w_enc: [D, 2Z]       bf16   (fused mu | 0.5*logvar heads, resident)
    # b_enc: [1, 2Z]       f32
    # eps:   [S, TB, Z]    bf16   (per-sample noise for this batch tile)
    # w_c:   [Z, 128]      bf16   (zero-padded classifier, resident)
    # b_c:   [1, 128]      f32    (zero-padded)
    # out:   [TB, 128]     f32
    zdim = w_c_ref.shape[0]

    x = x_ref[...]
    w_c = w_c_ref[...]

    # Fused stochastic-encoder heads: one MXU traversal of K=D, f32 acc.
    enc = jnp.dot(x, w_enc_ref[...],
                  preferred_element_type=jnp.float32) + b_enc_ref[...]  # [TB,2Z]
    mu = enc[:, :zdim]                                                  # [TB,Z] f32
    std = jnp.exp(enc[:, zdim:])   # 0.5 scale pre-folded into the logvar head

    # Classifier is linear, so logits_s = (mu @ Wc + bc) + (std*eps_s) @ Wc.
    base = jnp.dot(mu.astype(w_c.dtype), w_c,
                   preferred_element_type=jnp.float32) + b_c_ref[...]   # [TB,128]
    std_b = std.astype(eps_ref.dtype)                                   # bf16

    def sample_logits(s_idx):
        pert = (std_b * eps_ref[s_idx]).astype(w_c.dtype)               # [TB,Z]
        return base + jnp.dot(pert, w_c, preferred_element_type=jnp.float32)

    # mean_p_logits: online logsumexp over the small static sample dim,
    # statically unrolled; everything stays on sublane-aligned [TB,128] tiles.
    run_max = sample_logits(0)
    run_sum = jnp.ones_like(run_max)
    for s_idx in range(1, n_samples):
        lg = sample_logits(s_idx)
        new_max = jnp.maximum(run_max, lg)
        run_sum = run_sum * jnp.exp(run_max - new_max) + jnp.exp(lg - new_max)
        run_max = new_max

    out_ref[...] = (run_max + jnp.log(run_sum)
                    - math.log(float(n_samples))).astype(out_ref.dtype)


def prepare_params(w_mu, b_mu, w_lv, b_lv, w_c, b_c, n_classes, cpad=128):
    """One-time (init-time) parameter fusion / padding / casting."""
    # Fold the 0.5 logvar scale into the head so the kernel does exp() directly.
    w_enc = jnp.concatenate([w_mu, 0.5 * w_lv], axis=1).astype(jnp.bfloat16)
    b_enc = jnp.concatenate([b_mu, 0.5 * b_lv], axis=1).astype(jnp.float32)
    zdim = w_c.shape[0]
    # Zero-pad classifier to 128 output lanes (lane-dense, unmasked stores).
    w_c_p = jnp.zeros((zdim, cpad), jnp.bfloat16).at[:, :n_classes].set(
        w_c.astype(jnp.bfloat16))
    b_c_p = jnp.zeros((1, cpad), jnp.float32).at[:, :n_classes].set(
        b_c.astype(jnp.float32))
    return w_enc, b_enc, w_c_p, b_c_p


def mc_trnsf_classifier(x_nchw, eps, params, n_classes):
    """Forward pass of MCTrnsfClassifier.

    x_nchw: [B, C, H, W] f32;  eps: [S, B, Z] f32 (MC noise, sample dim first).
    params: output of prepare_params (hoisted out of the per-call path).
    """
    w_enc, b_enc, w_c_p, b_c_p = params
    B = x_nchw.shape[0]
    S, _, Z = eps.shape
    D = w_enc.shape[0]
    E2 = w_enc.shape[1]
    CPAD = w_c_p.shape[1]

    x_flat = x_nchw.reshape(B, -1).astype(jnp.bfloat16)   # == torch .view(B,-1)
    eps_b = eps.astype(jnp.bfloat16)

    # Batch tiling: tile rows are multiples of 8 sublanes; cap at 256 rows
    # (~1.5 MB tile working set incl. double buffers -> fits default scoped
    # VMEM on v5e/v6e (128 MiB phys) and v7x (64 MiB phys) with wide margin).
    TB = min(256, ((B + 7) // 8) * 8)
    B_pad = pl.cdiv(B, TB) * TB
    pad = B_pad - B
    if pad:
        x_flat = jnp.pad(x_flat, ((0, pad), (0, 0)))
        eps_b = jnp.pad(eps_b, ((0, 0), (0, pad), (0, 0)))

    kernel = functools.partial(_mc_clf_kernel, n_samples=S)

    out_padded = pl.pallas_call(
        kernel,
        out_shape=jax.ShapeDtypeStruct((B_pad, CPAD), jnp.float32),
        grid_spec=pltpu.PrefetchScalarGridSpec(
            num_scalar_prefetch=0,
            grid=(B_pad // TB,),
            in_specs=[
                pl.BlockSpec((TB, D), lambda i: (i, 0)),       # x batch tile
                pl.BlockSpec((D, E2), lambda i: (0, 0)),       # w_enc (resident)
                pl.BlockSpec((1, E2), lambda i: (0, 0)),       # b_enc
                pl.BlockSpec((S, TB, Z), lambda i: (0, i, 0)), # eps batch tile
                pl.BlockSpec((Z, CPAD), lambda i: (0, 0)),     # w_c (resident)
                pl.BlockSpec((1, CPAD), lambda i: (0, 0)),     # b_c
            ],
            out_specs=pl.BlockSpec((TB, CPAD), lambda i: (i, 0)),
        ),
        compiler_params=pltpu.CompilerParams(
            dimension_semantics=("parallel",),   # shard batch tiles across TCs
        ),
    )(x_flat, w_enc, b_enc, eps_b, w_c_p, b_c_p)

    # Padded rows / padded logit lanes (exact zeros by construction) dropped.
    return out_padded[:B, :n_classes]


def _reference(x_nchw, w_mu, b_mu, w_lv, b_lv, eps, w_c, b_c):
    """Pure-JAX f32 reference of the module's forward."""
    Bv = x_nchw.shape[0]
    xf = x_nchw.reshape(Bv, -1)
    mu = xf @ w_mu + b_mu
    std = jnp.exp(0.5 * (xf @ w_lv + b_lv))
    z = mu[None] + std[None] * eps                         # [S, B, Z]
    logits = jnp.einsum("sbz,zc->sbc", z, w_c) + b_c       # [S, B, NCLS]
    return jax.nn.logsumexp(logits, axis=0) - jnp.log(float(eps.shape[0]))


if __name__ == "__main__":
    # Small shapes consistent with the module's forward.
    B, C, H, W = 2, 4, 16, 16           # input images, NCHW
    D = C * H * W                       # 1024, flattened input to transformer
    Z = 32                              # z_dim (transformer output / clf input)
    NCLS = 10                           # n_classes
    S = 4                               # n_test_samples (MC samples)

    key = jax.random.PRNGKey(0)
    k_x, k_wmu, k_bmu, k_wlv, k_wc, k_eps = jax.random.split(key, 6)

    x = jax.random.normal(k_x, (B, C, H, W), jnp.float32)

    # Deterministic parameter init (shapes implied by __init__: z_dim, n_classes).
    w_mu = jax.random.normal(k_wmu, (D, Z), jnp.float32) * (1.0 / math.sqrt(D))
    b_mu = jax.random.normal(k_bmu, (1, Z), jnp.float32) * 0.01
    w_lv = jax.random.normal(k_wlv, (D, Z), jnp.float32) * (1.0 / math.sqrt(D))
    b_lv = jnp.full((1, Z), -2.0, jnp.float32)           # small initial variance
    w_c = jax.random.normal(k_wc, (Z, NCLS), jnp.float32) * (1.0 / math.sqrt(Z))
    b_c = jnp.zeros((1, NCLS), jnp.float32)

    # MC noise for the reparameterized samples (deterministic input, [S, B, Z]).
    eps = jax.random.normal(k_eps, (S, B, Z), jnp.float32)

    # Init-time (hoisted) parameter prep.
    params = prepare_params(w_mu, b_mu, w_lv, b_lv, w_c, b_c, NCLS)

    out = mc_trnsf_classifier(x, eps, params, NCLS)
    jax.block_until_ready(out)
    assert out.shape == (B, NCLS)

    ref = _reference(x, w_mu, b_mu, w_lv, b_lv, eps, w_c, b_c)
    assert jnp.all(jnp.isfinite(out))
    assert jnp.allclose(out, ref, atol=1e-1, rtol=5e-2), (
        "mismatch vs f32 reference (beyond bf16 tolerance)")
    print("KERNEL_OK")
</pallas_src>

<mosaic_0001>
module attributes {stable_mosaic.version = 11 : i64} {
  func.func @_mc_clf_kernel(%arg0: i32, %arg1: memref<8x1024xbf16, #tpu.memory_space<vmem>>, %arg2: memref<1024x64xbf16, #tpu.memory_space<vmem>>, %arg3: memref<1x64xf32, #tpu.memory_space<vmem>>, %arg4: memref<4x8x32xbf16, #tpu.memory_space<vmem>>, %arg5: memref<32x128xbf16, #tpu.memory_space<vmem>>, %arg6: memref<1x128xf32, #tpu.memory_space<vmem>>, %arg7: memref<8x128xf32, #tpu.memory_space<vmem>>) attributes {dimension_semantics = [#tpu.dimension_semantics<parallel>], iteration_bounds = array<i64: 1>, scalar_prefetch = 0 : i64, scratch_operands = 0 : i64, tpu.core_type = #tpu.core_type<tc>, window_params = [{transform_indices = @transform_0, window_bounds = array<i64: 8, 1024>}, {pipeline_mode = #tpu.pipeline_mode<synchronous>, transform_indices = @transform_1, window_bounds = array<i64: 1024, 64>}, {pipeline_mode = #tpu.pipeline_mode<synchronous>, transform_indices = @transform_2, window_bounds = array<i64: 1, 64>}, {transform_indices = @transform_3, window_bounds = array<i64: 4, 8, 32>}, {pipeline_mode = #tpu.pipeline_mode<synchronous>, transform_indices = @transform_4, window_bounds = array<i64: 32, 128>}, {pipeline_mode = #tpu.pipeline_mode<synchronous>, transform_indices = @transform_5, window_bounds = array<i64: 1, 128>}, {transform_indices = @transform_6, window_bounds = array<i64: 8, 128>}]} {
    %c0 = arith.constant 0 : index
    %c0_0 = arith.constant 0 : index
    %0 = vector.load %arg1[%c0, %c0_0] : memref<8x1024xbf16, #tpu.memory_space<vmem>>, vector<8x1024xbf16>
    %c0_1 = arith.constant 0 : index
    %c0_2 = arith.constant 0 : index
    %1 = vector.load %arg5[%c0_1, %c0_2] : memref<32x128xbf16, #tpu.memory_space<vmem>>, vector<32x128xbf16>
    %c0_3 = arith.constant 0 : index
    %c0_4 = arith.constant 0 : index
    %2 = vector.load %arg2[%c0_3, %c0_4] : memref<1024x64xbf16, #tpu.memory_space<vmem>>, vector<1024x64xbf16>
    %cst = arith.constant dense<0.000000e+00> : vector<8x64xf32>
    %3 = tpu.matmul %0, %2, %cst {dimension_numbers = #tpu.dot_dimension_numbers<[1], [0], [0], [1], [0, 0, 1, 1], [], []>} : vector<8x1024xbf16>, vector<1024x64xbf16>, vector<8x64xf32> -> vector<8x64xf32>
    %c0_5 = arith.constant 0 : index
    %c0_6 = arith.constant 0 : index
    %4 = vector.load %arg3[%c0_5, %c0_6] : memref<1x64xf32, #tpu.memory_space<vmem>>, vector<1x64xf32>
    %5 = vector.broadcast %4 : vector<1x64xf32> to vector<8x64xf32>
    %6 = arith.addf %3, %5 : vector<8x64xf32>
    %7 = vector.extract_strided_slice %6 {offsets = [0, 0], sizes = [8, 32], strides = [1, 1]} : vector<8x64xf32> to vector<8x32xf32>
    %8 = vector.extract_strided_slice %6 {offsets = [0, 32], sizes = [8, 32], strides = [1, 1]} : vector<8x64xf32> to vector<8x32xf32>
    %9 = math.exp %8 : vector<8x32xf32>
    %10 = arith.truncf %7 : vector<8x32xf32> to vector<8x32xbf16>
    %cst_7 = arith.constant dense<0.000000e+00> : vector<8x128xf32>
    %11 = tpu.matmul %10, %1, %cst_7 {dimension_numbers = #tpu.dot_dimension_numbers<[1], [0], [0], [1], [0, 0, 1, 1], [], []>} : vector<8x32xbf16>, vector<32x128xbf16>, vector<8x128xf32> -> vector<8x128xf32>
    %c0_8 = arith.constant 0 : index
    %c0_9 = arith.constant 0 : index
    %12 = vector.load %arg6[%c0_8, %c0_9] : memref<1x128xf32, #tpu.memory_space<vmem>>, vector<1x128xf32>
    %13 = vector.broadcast %12 : vector<1x128xf32> to vector<8x128xf32>
    %14 = arith.addf %11, %13 : vector<8x128xf32>
    %15 = arith.truncf %9 : vector<8x32xf32> to vector<8x32xbf16>
    %c0_10 = arith.constant 0 : index
    %c0_11 = arith.constant 0 : index
    %c0_12 = arith.constant 0 : index
    %16 = vector.load %arg4[%c0_10, %c0_11, %c0_12] : memref<4x8x32xbf16, #tpu.memory_space<vmem>>, vector<1x8x32xbf16>
    %17 = vector.shape_cast %16 : vector<1x8x32xbf16> to vector<8x32xbf16>
    %18 = arith.mulf %15, %17 : vector<8x32xbf16>
    %cst_13 = arith.constant dense<0.000000e+00> : vector<8x128xf32>
    %19 = tpu.matmul %18, %1, %cst_13 {dimension_numbers = #tpu.dot_dimension_numbers<[1], [0], [0], [1], [0, 0, 1, 1], [], []>} : vector<8x32xbf16>, vector<32x128xbf16>, vector<8x128xf32> -> vector<8x128xf32>
    %20 = arith.addf %14, %19 : vector<8x128xf32>
    %cst_14 = arith.constant 1.000000e+00 : f32
    %21 = vector.broadcast %cst_14 : f32 to vector<8x128xf32>
    %c1 = arith.constant 1 : index
    %c0_15 = arith.constant 0 : index
    %c0_16 = arith.constant 0 : index
    %22 = vector.load %arg4[%c1, %c0_15, %c0_16] : memref<4x8x32xbf16, #tpu.memory_space<vmem>>, vector<1x8x32xbf16>
    %23 = vector.shape_cast %22 : vector<1x8x32xbf16> to vector<8x32xbf16>
    %24 = arith.mulf %15, %23 : vector<8x32xbf16>
    %cst_17 = arith.constant dense<0.000000e+00> : vector<8x128xf32>
    %25 = tpu.matmul %24, %1, %cst_17 {dimension_numbers = #tpu.dot_dimension_numbers<[1], [0], [0], [1], [0, 0, 1, 1], [], []>} : vector<8x32xbf16>, vector<32x128xbf16>, vector<8x128xf32> -> vector<8x128xf32>
    %26 = arith.addf %14, %25 : vector<8x128xf32>
    %27 = arith.maximumf %20, %26 : vector<8x128xf32>
    %28 = arith.subf %20, %27 : vector<8x128xf32>
    %29 = math.exp %28 : vector<8x128xf32>
    %30 = arith.mulf %21, %29 : vector<8x128xf32>
    %31 = arith.subf %26, %27 : vector<8x128xf32>
    %32 = math.exp %31 : vector<8x128xf32>
    %33 = arith.addf %30, %32 : vector<8x128xf32>
    %c2 = arith.constant 2 : index
    %c0_18 = arith.constant 0 : index
    %c0_19 = arith.constant 0 : index
    %34 = vector.load %arg4[%c2, %c0_18, %c0_19] : memref<4x8x32xbf16, #tpu.memory_space<vmem>>, vector<1x8x32xbf16>
    %35 = vector.shape_cast %34 : vector<1x8x32xbf16> to vector<8x32xbf16>
    %36 = arith.mulf %15, %35 : vector<8x32xbf16>
    %cst_20 = arith.constant dense<0.000000e+00> : vector<8x128xf32>
    %37 = tpu.matmul %36, %1, %cst_20 {dimension_numbers = #tpu.dot_dimension_numbers<[1], [0], [0], [1], [0, 0, 1, 1], [], []>} : vector<8x32xbf16>, vector<32x128xbf16>, vector<8x128xf32> -> vector<8x128xf32>
    %38 = arith.addf %14, %37 : vector<8x128xf32>
    %39 = arith.maximumf %27, %38 : vector<8x128xf32>
    %40 = arith.subf %27, %39 : vector<8x128xf32>
    %41 = math.exp %40 : vector<8x128xf32>
    %42 = arith.mulf %33, %41 : vector<8x128xf32>
    %43 = arith.subf %38, %39 : vector<8x128xf32>
    %44 = math.exp %43 : vector<8x128xf32>
    %45 = arith.addf %42, %44 : vector<8x128xf32>
    %c3 = arith.constant 3 : index
    %c0_21 = arith.constant 0 : index
    %c0_22 = arith.constant 0 : index
    %46 = vector.load %arg4[%c3, %c0_21, %c0_22] : memref<4x8x32xbf16, #tpu.memory_space<vmem>>, vector<1x8x32xbf16>
    %47 = vector.shape_cast %46 : vector<1x8x32xbf16> to vector<8x32xbf16>
    %48 = arith.mulf %15, %47 : vector<8x32xbf16>
    %cst_23 = arith.constant dense<0.000000e+00> : vector<8x128xf32>
    %49 = tpu.matmul %48, %1, %cst_23 {dimension_numbers = #tpu.dot_dimension_numbers<[1], [0], [0], [1], [0, 0, 1, 1], [], []>} : vector<8x32xbf16>, vector<32x128xbf16>, vector<8x128xf32> -> vector<8x128xf32>
    %50 = arith.addf %14, %49 : vector<8x128xf32>
    %51 = arith.maximumf %39, %50 : vector<8x128xf32>
    %52 = arith.subf %39, %51 : vector<8x128xf32>
    %53 = math.exp %52 : vector<8x128xf32>
    %54 = arith.mulf %45, %53 : vector<8x128xf32>
    %55 = arith.subf %50, %51 : vector<8x128xf32>
    %56 = math.exp %55 : vector<8x128xf32>
    %57 = arith.addf %54, %56 : vector<8x128xf32>
    %58 = math.log %57 : vector<8x128xf32>
    %59 = arith.addf %51, %58 : vector<8x128xf32>
    %cst_24 = arith.constant 1.38629436 : f32
    %60 = vector.broadcast %cst_24 : f32 to vector<8x128xf32>
    %61 = arith.subf %59, %60 : vector<8x128xf32>
    %c0_25 = arith.constant 0 : index
    %c0_26 = arith.constant 0 : index
    %62 = vector.load %arg7[%c0_25, %c0_26] : memref<8x128xf32, #tpu.memory_space<vmem>>, vector<8x128xf32>
    tpu.vector_store %arg7[%c0_25, %c0_26], %61 {strides = array<i32>} : memref<8x128xf32, #tpu.memory_space<vmem>>, vector<8x128xf32>,
    return
  }
  func.func @transform_0(%arg0: i32) -> (i32, i32) {
    %c0_i32 = arith.constant 0 : i32
    %c0_i32_0 = arith.constant 0 : i32
    return %arg0, %c0_i32 : i32, i32
  }
  func.func @transform_1(%arg0: i32) -> (i32, i32) {
    %c0_i32 = arith.constant 0 : i32
    %c0_i32_0 = arith.constant 0 : i32
    %c0_i32_1 = arith.constant 0 : i32
    return %c0_i32, %c0_i32_0 : i32, i32
  }
  func.func @transform_2(%arg0: i32) -> (i32, i32) {
    %c0_i32 = arith.constant 0 : i32
    %c0_i32_0 = arith.constant 0 : i32
    %c0_i32_1 = arith.constant 0 : i32
    return %c0_i32, %c0_i32_0 : i32, i32
  }
  func.func @transform_3(%arg0: i32) -> (i32, i32, i32) {
    %c0_i32 = arith.constant 0 : i32
    %c0_i32_0 = arith.constant 0 : i32
    %c0_i32_1 = arith.constant 0 : i32
    return %c0_i32, %arg0, %c0_i32_0 : i32, i32, i32
  }
  func.func @transform_4(%arg0: i32) -> (i32, i32) {
    %c0_i32 = arith.constant 0 : i32
    %c0_i32_0 = arith.constant 0 : i32
    %c0_i32_1 = arith.constant 0 : i32
    return %c0_i32, %c0_i32_0 : i32, i32
  }
  func.func @transform_5(%arg0: i32) -> (i32, i32) {
    %c0_i32 = arith.constant 0 : i32
    %c0_i32_0 = arith.constant 0 : i32
    %c0_i32_1 = arith.constant 0 : i32
    return %c0_i32, %c0_i32_0 : i32, i32
  }
  func.func @transform_6(%arg0: i32) -> (i32, i32) {
    %c0_i32 = arith.constant 0 : i32
    %c0_i32_0 = arith.constant 0 : i32
    return %arg0, %c0_i32 : i32, i32
  }
}

</mosaic_0001>

<bundles_post_ra>
// kernel: tpu_custom_call.1
= control target key start
LH: loop header
LB: loop body
LE: loop exit
PB: predicated region body
PF: predicated region fallthrough
CT: control target
= control target key end

     0   :  { %s1428_s16 = smov 32   ;;  %s1738_s0 = inlined_call_operand.vmem [shape: bf16[8,1024], index: 0, kind: input, shape index: {}]   ;;  %s1739_s1 = inlined_call_operand.vmem [shape: bf16[1024,64], index: 1, kind: input, shape index: {}]   ;;  %s1740_s2 = inlined_call_operand.vmem [shape: f32[1,64], index: 2, kind: input, shape index: {}]   ;;  %s1741_s3 = inlined_call_operand.vmem [shape: bf16[4,8,32], index: 3, kind: input, shape index: {}]   ;;  %s1742_s4 = inlined_call_operand.vmem [shape: bf16[32,128], index: 4, kind: input, shape index: {}]   ;;  %s1743_s5 = inlined_call_operand.vmem [shape: f32[1,128], index: 5, kind: input, shape index: {}]   ;;  %s1744_s6 = inlined_call_operand.hbm [shape: f32[8,128], index: 6, kind: output, shape index: {}]  }
   0x1   :  { %v1312_v0 = vld [vmem:[%s1739_s1 + $0x78] sm:$0xff]   ;;  %v1316_v4 = vld [vmem:[%s1739_s1 + $0x70] sm:$0xff]   ;;  %v1320_v8 = vld [vmem:[%s1739_s1 + $0x68] sm:$0xff]  }
   0x2   :  { %v1313_v1 = vld [vmem:[%s1739_s1 + $0xf8] sm:$0xff]   ;;  %1164 = vmatprep.subr.bf16.mxu0 %v1312_v0  ;;  %v1317_v5 = vld [vmem:[%s1739_s1 + $0xf0] sm:$0xff]   ;;  %v1321_v9 = vld [vmem:[%s1739_s1 + $0xe8] sm:$0xff]  }
   0x3   :  { %v1314_v2 = vld [vmem:[%s1739_s1 + $0x38] sm:$0xff]   ;;  %1186 = vmatprep.subr.bf16.mxu1 %v1313_v1  ;;  %v1318_v6 = vld [vmem:[%s1739_s1 + $0x30] sm:$0xff]   ;;  %v1322_v10 = vld [vmem:[%s1739_s1 + $0x28] sm:$0xff]  }
   0x4   :  { %v1315_v3 = vld [vmem:[%s1739_s1 + $0xb8] sm:$0xff]   ;;  %1165 = vmatpush3.bf16.msra.mxu0 %v1314_v2  ;;  %v1319_v7 = vld [vmem:[%s1739_s1 + $0xb0] sm:$0xff]   ;;  %v1323_v11 = vld [vmem:[%s1739_s1 + $0xa8] sm:$0xff]  }
   0x5   :  { %1187 = vmatpush3.bf16.msra.mxu1 %v1315_v3  ;;  %1166 = vmatprep.subr.bf16.mxu0 %v1316_v4  ;;  %v1324_v12 = vld [vmem:[%s1739_s1 + $0x60] sm:$0xff]   ;;  %v1328_v16 = vld [vmem:[%s1739_s1 + $0x58] sm:$0xff]   ;;  %v1332_v20 = vld [vmem:[%s1739_s1 + $0x50] sm:$0xff]  }
   0x6   :  { %1188 = vmatprep.subr.bf16.mxu1 %v1317_v5  ;;  %v1325_v13 = vld [vmem:[%s1739_s1 + $0xe0] sm:$0xff]   ;;  %v1329_v17 = vld [vmem:[%s1739_s1 + $0xd8] sm:$0xff]   ;;  %v1333_v21 = vld [vmem:[%s1739_s1 + $0xd0] sm:$0xff]  }
   0x7   :  { %v1326_v14 = vld [vmem:[%s1739_s1 + $0x20] sm:$0xff]   ;;  %v1330_v18 = vld [vmem:[%s1739_s1 + $0x18] sm:$0xff]   ;;  %v1334_v22 = vld [vmem:[%s1739_s1 + $0x10] sm:$0xff]  }
   0x8   :  { %1167 = vmatpush3.bf16.msra.mxu0 %v1318_v6  ;;  %v1327_v15 = vld [vmem:[%s1739_s1 + $0xa0] sm:$0xff]   ;;  %v1331_v19 = vld [vmem:[%s1739_s1 + $0x98] sm:$0xff]   ;;  %v1335_v23 = vld [vmem:[%s1739_s1 + $0x90] sm:$0xff]  }
   0x9   :  { %1189 = vmatpush3.bf16.msra.mxu1 %v1319_v7  ;;  %1168 = vmatprep.subr.bf16.mxu0 %v1320_v8  ;;  %v1336_v24 = vld [vmem:[%s1739_s1 + $0x48] sm:$0xff]   ;;  %v1340_v28 = vld [vmem:[%s1739_s1 + $0x40] sm:$0xff]   ;;  %v1348_v38 = vld [vmem:[%s1739_s1 + $0x178] sm:$0xff]  }
   0xa   :  { %1190 = vmatprep.subr.bf16.mxu1 %v1321_v9  ;;  %v1337_v25 = vld [vmem:[%s1739_s1 + $0xc8] sm:$0xff]   ;;  %v1341_v29 = vld [vmem:[%s1739_s1 + $0xc0] sm:$0xff]   ;;  %v1349_v39 = vld [vmem:[%s1739_s1 + $0x1f8] sm:$0xff]  }
   0xb   :  { %v1338_v26 = vld [vmem:[%s1739_s1 + $0x8] sm:$0xff]   ;;  %v1342_v30 = vld [vmem:[%s1739_s1] sm:$0xff]   ;;  %v1350_v40 = vld [vmem:[%s1739_s1 + $0x138] sm:$0xff]  }
   0xc   :  { %1169 = vmatpush3.bf16.msra.mxu0 %v1322_v10  ;;  %v1339_v27 = vld [vmem:[%s1739_s1 + $0x88] sm:$0xff]   ;;  %v1343_v31 = vld [vmem:[%s1739_s1 + $0x80] sm:$0xff]   ;;  %v1351_v41 = vld [vmem:[%s1739_s1 + $0x1b8] sm:$0xff]  }
   0xd   :  { %1191 = vmatpush3.bf16.msra.mxu1 %v1323_v11  ;;  %1170 = vmatprep.subr.bf16.mxu0 %v1324_v12  ;;  %v25_v32 = vld [vmem:[%s1738_s0] sm:$0xff]  ;;  %v26_v33 = vld [vmem:[%s1738_s0 + $0x8] sm:$0xff]  ;;  %v1352_v42 = vld [vmem:[%s1739_s1 + $0x170] sm:$0xff]  }
   0xe   :  { %1192 = vmatprep.subr.bf16.mxu1 %v1325_v13  ;;  %v1076_v34 = vcombine.low %v25_v32, %v25_v32  ;;  %v1077_v35 = vcombine.high %v25_v32, %v25_v32  ;;  %v1078_v36 = vcombine.low %v26_v33, %v26_v33  ;;  %v1079_v37 = vcombine.high %v26_v33, %v26_v33  ;;  %v1353_v43 = vld [vmem:[%s1739_s1 + $0x1f0] sm:$0xff]   ;;  %v1356_v46 = vld [vmem:[%s1739_s1 + $0x168] sm:$0xff]   ;;  %v1360_v50 = vld [vmem:[%s1739_s1 + $0x160] sm:$0xff]  }
   0xf   :  { %v1354_v44 = vld [vmem:[%s1739_s1 + $0x130] sm:$0xff]   ;;  %v1357_v47 = vld [vmem:[%s1739_s1 + $0x1e8] sm:$0xff]   ;;  %v1361_v51 = vld [vmem:[%s1739_s1 + $0x1e0] sm:$0xff]  }
  0x10   :  { %1171 = vmatpush3.bf16.msra.mxu0 %v1326_v14  ;;  %612 = vmatprep.mubr.bf16.mxu0 %v1077_v35  ;;  %v1355_v45 = vld [vmem:[%s1739_s1 + $0x1b0] sm:$0xff]   ;;  %v1358_v48 = vld [vmem:[%s1739_s1 + $0x128] sm:$0xff]   ;;  %v1362_v52 = vld [vmem:[%s1739_s1 + $0x120] sm:$0xff]  }
  0x11   :  { %1193 = vmatpush3.bf16.msra.mxu1 %v1327_v15  ;;  %1172 = vmatprep.subr.bf16.mxu0 %v1328_v16  ;;  %v1359_v49 = vld [vmem:[%s1739_s1 + $0x1a8] sm:$0xff]   ;;  %v1363_v53 = vld [vmem:[%s1739_s1 + $0x1a0] sm:$0xff]   ;;  %v1364_v54 = vld [vmem:[%s1739_s1 + $0x158] sm:$0xff]  }
  0x12   :  { %1194 = vmatprep.subr.bf16.mxu1 %v1329_v17  ;;  %652 = vmatprep.mubr.bf16.mxu1 %v1079_v37  ;;  %v1365_v55 = vld [vmem:[%s1739_s1 + $0x1d8] sm:$0xff]   ;;  %v1368_v58 = vld [vmem:[%s1739_s1 + $0x150] sm:$0xff]   ;;  %v1372_v62 = vld [vmem:[%s1739_s1 + $0x148] sm:$0xff]  }
  0x13   :  { %v1366_v56 = vld [vmem:[%s1739_s1 + $0x118] sm:$0xff]   ;;  %v1369_v59 = vld [vmem:[%s1739_s1 + $0x1d0] sm:$0xff]   ;;  %v1373_v63 = vld [vmem:[%s1739_s1 + $0x1c8] sm:$0xff]  }
  0x14   :  { %1173 = vmatpush3.bf16.msra.mxu0 %v1330_v18  ;;  %v1367_v57 = vld [vmem:[%s1739_s1 + $0x198] sm:$0xff]   ;;  %v1370_v60 = vld [vmem:[%s1739_s1 + $0x110] sm:$0xff]   ;;  %v1374_v0 = vld [vmem:[%s1739_s1 + $0x108] sm:$0xff]  }
  0x15   :  { %1195 = vmatpush3.bf16.msra.mxu1 %v1331_v19  ;;  %1174 = vmatprep.subr.bf16.mxu0 %v1332_v20  ;;  %v1371_v61 = vld [vmem:[%s1739_s1 + $0x190] sm:$0xff]   ;;  %v1375_v1 = vld [vmem:[%s1739_s1 + $0x188] sm:$0xff]   ;;  %v1376_v2 = vld [vmem:[%s1739_s1 + $0x140] sm:$0xff]  }
  0x16   :  { %1196 = vmatprep.subr.bf16.mxu1 %v1333_v21  ;;  %v1377_v3 = vld [vmem:[%s1739_s1 + $0x1c0] sm:$0xff]   ;;  %v27_v6 = vld [vmem:[%s1738_s0 + $0x10] sm:$0xff]  ;;  %v28_v9 = vld [vmem:[%s1738_s0 + $0x18] sm:$0xff] }
  0x17   :  { %v1378_v4 = vld [vmem:[%s1739_s1 + $0x100] sm:$0xff]   ;;  %v1080_v7 = vcombine.low %v27_v6, %v27_v6  ;;  %v1081_v8 = vcombine.high %v27_v6, %v27_v6  ;;  %v1384_v10 = vld [vmem:[%s1741_s3 + $0x8] ss:$0 sps:$4 sm:$0xff]   ;;  %v1082_v11 = vcombine.low %v28_v9, %v28_v9  ;;  %v1083_v12 = vcombine.high %v28_v9, %v28_v9  ;;  %v1386_v14 = vld [vmem:[%s1741_s3 + $0xc] ss:$0 sps:$4 sm:$0xff]  }
  0x18   :  { %1175 = vmatpush3.bf16.msra.mxu0 %v1334_v22  ;;  %v1379_v5 = vld [vmem:[%s1739_s1 + $0x180] sm:$0xff]   ;;  %931 = vrot.lane.b32.xlu1 %v1384_v10, %s1428_s16 }
  0x19   :  { %1197 = vmatpush3.bf16.msra.mxu1 %v1335_v23  ;;  %1176 = vmatprep.subr.bf16.mxu0 %v1336_v24  ;;  %v1385_v13 = vld [vmem:[%s1741_s3] ss:$0 sps:$4 sm:$0xff]   ;;  %v1387_v15 = vld [vmem:[%s1741_s3 + $0x4] ss:$0 sps:$4 sm:$0xff]  }
  0x1a   :  { %1198 = vmatprep.subr.bf16.mxu1 %v1337_v25  ;;  %811 = vrot.lane.b32.xlu0 %v1385_v13, %s1428_s16 }
  0x1c   :  { %1177 = vmatpush3.bf16.msra.mxu0 %v1338_v26 }
  0x1d   :  { %1199 = vmatpush3.bf16.msra.mxu1 %v1339_v27  ;;  %1178 = vmatprep.subr.bf16.mxu0 %v1340_v28 }
  0x1e   :  { %1200 = vmatprep.subr.bf16.mxu1 %v1341_v29 }
  0x20   :  { %1179 = vmatpush3.bf16.msra.mxu0 %v1342_v30 }
  0x21   :  { %1201 = vmatpush3.bf16.msra.mxu1 %v1343_v31  ;;  %1208 = vmatprep.subr.bf16.mxu0 %v1348_v38 }
  0x22   :  { %1230 = vmatprep.subr.bf16.mxu1 %v1349_v39 }
  0x23   :  { %613 = vmatmul.mubr.bf16.vlgmr.msra.gmra.mxu0 %v1076_v34 }
  0x24   :  { %653 = vmatmul.mubr.bf16.vlgmr.msra.gmra.mxu1 %v1078_v36  ;;  %1209 = vmatpush3.bf16.msra.mxu0 %v1350_v40 }
  0x25   :  { %1231 = vmatpush3.bf16.msra.mxu1 %v1351_v41  ;;  %1210 = vmatprep.subr.bf16.mxu0 %v1352_v42 }
  0x26   :  { %1232 = vmatprep.subr.bf16.mxu1 %v1353_v43  ;;  %692 = vmatprep.mubr.bf16.mxu0 %v1081_v8 }
  0x27   :  { %732 = vmatprep.mubr.bf16.mxu1 %v1083_v12 }
  0x28   :  { %1211 = vmatpush3.bf16.msra.mxu0 %v1354_v44 }
  0x29   :  { %1233 = vmatpush3.bf16.msra.mxu1 %v1355_v45  ;;  %1212 = vmatprep.subr.bf16.mxu0 %v1356_v46 }
  0x2a   :  { %1234 = vmatprep.subr.bf16.mxu1 %v1357_v47 }
  0x2c   :  { %1213 = vmatpush3.bf16.msra.mxu0 %v1358_v48 }
  0x2d   :  { %1235 = vmatpush3.bf16.msra.mxu1 %v1359_v49  ;;  %1214 = vmatprep.subr.bf16.mxu0 %v1360_v50 }
  0x2e   :  { %1236 = vmatprep.subr.bf16.mxu1 %v1361_v51 }
  0x30   :  { %1215 = vmatpush3.bf16.msra.mxu0 %v1362_v52 }
  0x31   :  { %1237 = vmatpush3.bf16.msra.mxu1 %v1363_v53  ;;  %1216 = vmatprep.subr.bf16.mxu0 %v1364_v54 }
  0x32   :  { %1238 = vmatprep.subr.bf16.mxu1 %v1365_v55 }
  0x34   :  { %1217 = vmatpush3.bf16.msra.mxu0 %v1366_v56 }
  0x35   :  { %1239 = vmatpush3.bf16.msra.mxu1 %v1367_v57  ;;  %1218 = vmatprep.subr.bf16.mxu0 %v1368_v58 }
  0x36   :  { %1240 = vmatprep.subr.bf16.mxu1 %v1369_v59 }
  0x38   :  { %1219 = vmatpush3.bf16.msra.mxu0 %v1370_v60 }
  0x39   :  { %1241 = vmatpush3.bf16.msra.mxu1 %v1371_v61  ;;  %1220 = vmatprep.subr.bf16.mxu0 %v1372_v62 }
  0x3a   :  { %1242 = vmatprep.subr.bf16.mxu1 %v1373_v63 }
  0x3c   :  { %1221 = vmatpush3.bf16.msra.mxu0 %v1374_v0 }
  0x3d   :  { %1243 = vmatpush3.bf16.msra.mxu1 %v1375_v1  ;;  %1222 = vmatprep.subr.bf16.mxu0 %v1376_v2 }
  0x3e   :  { %1244 = vmatprep.subr.bf16.mxu1 %v1377_v3 }
  0x40   :  { %1223 = vmatpush3.bf16.msra.mxu0 %v1378_v4 }
  0x41   :  { %1245 = vmatpush3.bf16.msra.mxu1 %v1379_v5 }
  0x43   :  { %693 = vmatmul.mubr.bf16.vlgmr.msra.gmra.mxu0 %v1080_v7 }
  0x44   :  { %733 = vmatmul.mubr.bf16.vlgmr.msra.gmra.mxu1 %v1082_v11 }
  0x45   :  { %11 = vsyncpa [#allocation3], 0  ;;  %996 = vrot.lane.b32.xlu1 %v1386_v14, %s1428_s16  ;;  %867 = vrot.lane.b32.xlu0 %v1387_v15, %s1428_s16  ;;  %v1687_v16 = vld [vmem:[%s1742_s4 + $0x8] sm:$0xff]   ;;  %v1429_v17 = vmov 0.0   ;;  %v1698_v18 = vld [vmem:[%s1742_s4] sm:$0xff]   ;;  %vm1430_vm0 = vmmov 0  }
  0x46   :  { %1267 = vmatprep.subr.bf16.mxu0 %v1429_v17  ;;  %1275 = vmatprep.subr.bf16.mxu1 %v1429_v17  ;;  %v1075_v28 = vld [vmem:[%s1740_s2] ss:$0 sm:$0xff]  ;;  %vm762_vm1 = vcmask 261120   ;;  %s1431_s2 = smov 96  }
  0x47   :  { %1268 = vmatpush3.bf16.msra.mxu0 %v1687_v16  ;;  %1276 = vmatpush3.bf16.msra.mxu1 %v1687_v16  ;;  %v1148_v0 = vld [vmem:[%s1743_s5] ss:$0 sm:$0xff]  ;;  %s1432_s5 = smov [#allocation2]  }
  0x48   :  { %1269 = vmatprep.subr.bf16.mxu0 %v1429_v17  ;;  %1277 = vmatprep.subr.bf16.mxu1 %v1429_v17  ;;  %s1067_s26 = sshll.u32 %s1432_s5, 4  ;;  %s1068_s26 = int_to_ptr.vmem [resolvable:$true] %s1067_s26 }
  0x49   :  { %1271 = vmatprep.mubr.msk.bf16.mxu0 %vm1430_vm0, %v1429_v17  ;;  %1279 = vmatprep.mubr.msk.bf16.mxu1 %vm1430_vm0, %v1429_v17  ;;  %s1406_s27 = scalar_lea.vmem %s1068_s26, 128  ;;  %p1411_p1 = scmp.lt.s32.totalorder %s1068_s26, %s1068_s26 }
  0x4a   :  { %p1407_p0 = scmp.ne.s32.totalorder %s1068_s26, %s1406_s27  ;;  %p1412_p2 = scmp.lt.s32.totalorder %s1406_s27, %s1406_s27 }
  0x4b   :  { %1270 = vmatpush3.bf16.msra.mxu0 %v1698_v18  ;;  %1278 = vmatpush3.bf16.msra.mxu1 %v1698_v18 }
  0x4c   :  { %1283 = vmatprep.subr.bf16.mxu0 %v1429_v17  ;;  %1291 = vmatprep.subr.bf16.mxu1 %v1429_v17  ;;  %p1413_p3 = por %p1412_p2, %p1411_p1 }
  0x4e   :  { %p1414_p4 = pnand %p1413_p3, %p1407_p0 }
  0x8a   :  { %v932_v47 = vpop.permute.xlu1 %931 }
  0x8c   :  { %v812_v46 = vpop.permute.xlu0 %811 }
  0xb7   :  { %v868_v49 = vpop.permute.xlu0 %867  ;;  %v997_v53 = vpop.permute.xlu1 %996 }
  0xe3   :  { %v1180_v19 = vpop.f32.mrf.mxu0 }
  0xe4   :  { %v1202_v20 = vpop.f32.mrf.mxu1 }
  0xe5   :  { %v1181_v21 = vpop.f32.mrf.mxu0 }
  0xe6   :  { %v1203_v22 = vpop.f32.mrf.mxu1  ;;  %v1182_v27 = vadd.f32 %v1181_v21, %v1180_v19 }
  0xe7   :  { %v1183_v23 = vpop.f32.mrf.mxu0  ;;  %v1204_v30 = vadd.f32 %v1203_v22, %v1202_v20 }
  0xe8   :  { %v1205_v24 = vpop.f32.mrf.mxu1  ;;  %v615_v29 = vadd.f32 %v1182_v27, %v1075_v28 }
  0xe9   :  { %v1184_v25 = vpop.f32.mrf.mxu0 }
  0xea   :  { %v1206_v26 = vpop.f32.mrf.mxu1  ;;  %v655_v35 = vadd.f32 %v1204_v30, %v615_v29 }
 0x103   :  { %v1224_v31 = vpop.f32.mrf.mxu0 }
 0x104   :  { %v1246_v32 = vpop.f32.mrf.mxu1 }
 0x105   :  { %v1225_v33 = vpop.f32.mrf.mxu0 }
 0x106   :  { %v1247_v34 = vpop.f32.mrf.mxu1  ;;  %v1226_v36 = vadd.f32 %v1225_v33, %v1224_v31 }
 0x107   :  { %v1227_v37 = vpop.f32.mrf.mxu0  ;;  %v1248_v40 = vadd.f32 %v1247_v34, %v1246_v32 }
 0x108   :  { %v1249_v38 = vpop.f32.mrf.mxu1  ;;  %v695_v39 = vadd.f32 %v1226_v36, %v655_v35 }
 0x109   :  { %v1228_v41 = vpop.f32.mrf.mxu0 }
 0x10a   :  { %v1250_v42 = vpop.f32.mrf.mxu1  ;;  %v735_v43 = vadd.f32 %v1248_v40, %v695_v39 }
 0x10c   :  { %v740_v44 = vmul.f32 1.442695, %v735_v43  ;;  %v742_v45 = vpack.c.bf16 %v735_v43, %v735_v43 }
 0x10e   :  { %1390 = vpow2.f32 %v740_v44  ;;  %1272 = vmatmul.mubr.msk.bf16.vlgmr.msra.gmra.mxu0 %vm762_vm1, %v742_v45 }
 0x10f   :  { %1284 = vmatpush3.bf16.msra.mxu0 %v1687_v16  ;;  %1287 = vmatprep.mubr.msk.bf16.mxu0 %vm1430_vm0, %v1429_v17 }
 0x110   :  { %1285 = vmatprep.subr.bf16.mxu0 %v1429_v17 }
 0x113   :  { %1286 = vmatpush3.bf16.msra.mxu0 %v1698_v18 }
 0x114   :  { %1299 = vmatprep.subr.bf16.mxu0 %v1429_v17 }
 0x11b   :  { %v1391_v48 = vpop.eup %1390 }
 0x11c   :  { %v806_v50 = vpack.c.bf16 %v1391_v48, %v1391_v48 }
 0x11e   :  { %v814_v51 = vmul.bf16 %v812_v46, %v806_v50  ;;  %v870_v52 = vmul.bf16 %v868_v49, %v806_v50  ;;  %v934_v54 = vmul.bf16 %v932_v47, %v806_v50  ;;  %v999_v55 = vmul.bf16 %v997_v53, %v806_v50 }
 0x120   :  { %872 = vrot.lane.b32.xlu1 %v870_v52, %s1431_s2  ;;  %816 = vrot.lane.b32.xlu0 %v814_v51, %s1431_s2 }
 0x124   :  { %1001 = vrot.lane.b32.xlu1 %v999_v55, %s1431_s2  ;;  %936 = vrot.lane.b32.xlu0 %v934_v54, %s1431_s2 }
 0x192   :  { %v873_v56 = vpop.permute.xlu1 %872  ;;  %v817_v57 = vpop.permute.xlu0 %816 }
 0x193   :  { %1280 = vmatmul.mubr.msk.bf16.vlgmr.msra.gmra.mxu1 %vm762_vm1, %v817_v57  ;;  %1288 = vmatmul.mubr.msk.bf16.vlgmr.msra.gmra.mxu0 %vm762_vm1, %v873_v56 }
 0x194   :  { %1292 = vmatpush3.bf16.msra.mxu1 %v1687_v16  ;;  %1300 = vmatpush3.bf16.msra.mxu0 %v1687_v16 }
 0x195   :  { %1293 = vmatprep.subr.bf16.mxu1 %v1429_v17  ;;  %1301 = vmatprep.subr.bf16.mxu0 %v1429_v17 }
 0x196   :  { %1295 = vmatprep.mubr.msk.bf16.mxu1 %vm1430_vm0, %v1429_v17  ;;  %1303 = vmatprep.mubr.msk.bf16.mxu0 %vm1430_vm0, %v1429_v17  ;;  %v1002_v58 = vpop.permute.xlu1 %1001  ;;  %v937_v59 = vpop.permute.xlu0 %936 }
 0x198   :  { %1294 = vmatpush3.bf16.msra.mxu1 %v1698_v18  ;;  %1302 = vmatpush3.bf16.msra.mxu0 %v1698_v18 }
 0x19b   :  { %1296 = vmatmul.mubr.msk.bf16.vlgmr.msra.gmra.mxu1 %vm762_vm1, %v937_v59  ;;  %1304 = vmatmul.mubr.msk.bf16.vlgmr.msra.gmra.mxu0 %vm762_vm1, %v1002_v58 }
 0x1ce   :  { %v800_v60 = vpop.f32.mrf.mxu0 }
 0x1cf   :  { %v801_v1 = vadd.f32 %v1148_v0, %v800_v60 }
 0x1d0   :  { %v1273_v61 = vpop.f32.mrf.mxu0 }
 0x1d2   :  { %v803_v62 = vpop.f32.mrf.mxu0 }
 0x1d4   :  { %v1274_v63 = vpop.f32.mrf.mxu0 }
 0x253   :  { %v855_v2 = vpop.f32.mrf.mxu1  ;;  %v911_v3 = vpop.f32.mrf.mxu0 }
 0x254   :  { %v861_v4 = vadd.f32 %v855_v2, %v801_v1  ;;  %v917_v5 = vadd.f32 %v911_v3, %v801_v1 }
 0x255   :  { %v1281_v6 = vpop.f32.mrf.mxu1  ;;  %v1289_v7 = vpop.f32.mrf.mxu0 }
 0x256   :  { %v918_v8 = vmax.f32 %v861_v4, %v917_v5 }
 0x257   :  { %v858_v9 = vpop.f32.mrf.mxu1  ;;  %v914_v10 = vpop.f32.mrf.mxu0 }
 0x258   :  { %v919_v11 = vsub.f32 %v861_v4, %v918_v8  ;;  %v922_v12 = vsub.f32 %v917_v5, %v918_v8 }
 0x259   :  { %v1282_v13 = vpop.f32.mrf.mxu1  ;;  %v1290_v14 = vpop.f32.mrf.mxu0 }
 0x25a   :  { %v920_v15 = vmul.f32 1.442695, %v919_v11  ;;  %v923_v18 = vmul.f32 1.442695, %v922_v12 }
 0x25b   :  { %v975_v16 = vpop.f32.mrf.mxu1  ;;  %v1040_v17 = vpop.f32.mrf.mxu0 }
 0x25c   :  { %v981_v19 = vadd.f32 %v975_v16, %v801_v1  ;;  %v1046_v23 = vadd.f32 %v1040_v17, %v801_v1  ;;  %1392 = vpow2.f32 %v920_v15 }
 0x25d   :  { %v1297_v20 = vpop.f32.mrf.mxu1  ;;  %v1305_v21 = vpop.f32.mrf.mxu0  ;;  %1394 = vpow2.f32 %v923_v18 }
 0x25e   :  { %v982_v22 = vmax.f32 %v918_v8, %v981_v19 }
 0x25f   :  { %v978_v24 = vpop.f32.mrf.mxu1  ;;  %v1043_v25 = vpop.f32.mrf.mxu0 }
 0x260   :  { %v983_v26 = vsub.f32 %v918_v8, %v982_v22  ;;  %v987_v27 = vsub.f32 %v981_v19, %v982_v22  ;;  %v1047_v28 = vmax.f32 %v982_v22, %v1046_v23 }
 0x261   :  { %v1298_v29 = vpop.f32.mrf.mxu1  ;;  %v1306_v30 = vpop.f32.mrf.mxu0 }
 0x262   :  { %v984_v31 = vmul.f32 1.442695, %v983_v26  ;;  %v988_v32 = vmul.f32 1.442695, %v987_v27  ;;  %v1048_v33 = vsub.f32 %v982_v22, %v1047_v28  ;;  %v1052_v34 = vsub.f32 %v1046_v23, %v1047_v28 }
 0x264   :  { %1396 = vpow2.f32 %v984_v31  ;;  %v1049_v35 = vmul.f32 1.442695, %v1048_v33  ;;  %v1053_v36 = vmul.f32 1.442695, %v1052_v34 }
 0x265   :  { %1398 = vpow2.f32 %v988_v32 }
 0x266   :  { %1400 = vpow2.f32 %v1049_v35 }
 0x267   :  { %1402 = vpow2.f32 %v1053_v36 }
 0x269   :  { %v1393_v37 = vpop.eup %1392 }
 0x26a   :  { %v1395_v38 = vpop.eup %1394 }
 0x26b   :  { %v925_v39 = vadd.f32 %v1395_v38, %v1393_v37 }
 0x271   :  { %v1397_v40 = vpop.eup %1396 }
 0x272   :  { %v986_v41 = vmul.f32 %v1397_v40, %v925_v39  ;;  %v1399_v42 = vpop.eup %1398 }
 0x273   :  { %v1401_v44 = vpop.eup %1400 }
 0x274   :  { %v990_v43 = vadd.f32 %v1399_v42, %v986_v41  ;;  %v1403_v46 = vpop.eup %1402 }
 0x276   :  { %v1051_v45 = vmul.f32 %v1401_v44, %v990_v43 }
 0x278   :  { %v1055_v47 = vadd.f32 %v1403_v46, %v1051_v45 }
 0x27a   :  { %1404 = vlog2.f32 %v1055_v47 }
 0x287   :  { %v1405_v48 = vpop.eup %1404 }
 0x288   :  { %v1057_v49 = vmul.f32 0.6931472, %v1405_v48 }
 0x28a   :  { %v1058_v50 = vadd.f32 %v1057_v49, %v1047_v28 }
 0x28c   :  { %v1163_v51 = vadd.f32 -1.3862944, %v1058_v50 }
 0x28e   :  { %1060 = vst [vmem:[#allocation2] sm:$0xff] %v1163_v51 }
 0x28f   :  { %1417 = shalt.err (!%p1414_p4)
}
 0x290   :  { %1070 = dma.vmem_to_hbm [thread:$0]  %s1068_s26, 128, %s1744_s6, [#allocation3]  }
 0x291   :  { %1426 = dma.done.wait [#allocation3], 128  }
 0x292   :  { %1427 = vsyncadd [#allocation3], 4294967168 }
 0x293   :  { %1074 = vsyncpa [#allocation3], 1 }

</bundles_post_ra>
